<compile_context>
chip_gen: v7x
topology: tpu7x:2x2x1
jax: 0.10.0
libtpu: 0.0.40
codegen_flags: <defaults>
</compile_context>

<pallas_src>
import math

import jax
import jax.numpy as jnp
from jax.experimental import pallas as pl
from jax.experimental.pallas import tpu as pltpu


def _time_embedding_kernel(t_ref, expand_ref, off_ref, out_ref):
    """One row-tile of the (packed) embedding.

    t_ref:      (TB, k)  f32  -- k timesteps packed per output row
    expand_ref: (k,  W)  f32  -- block-diagonal frequency table, W = k*edim
    off_ref:    (1,  W)  f32  -- phase offsets (0 | pi/2 per half), tiled k times
    out_ref:    (TB, W)  out dtype
    """
    k = t_ref.shape[1]
    t = t_ref[...]
    expand = expand_ref[...]
    # phase = sum_j t[:, j] * expand[j, :]  (k full-width broadcast FMAs;
    # static Python loop unrolled at trace time; k == 1 when edim >= 128).
    phase = t[:, 0:1] * expand[0:1, :]
    for j in range(1, k):
        phase = phase + t[:, j:j + 1] * expand[j:j + 1, :]
    # One add + one sin per element, single full-width lane-dense store.
    out_ref[...] = jnp.sin(phase + off_ref[...]).astype(out_ref.dtype)


def _pick_tile_rows(rows, row_width, itemsize, budget_bytes):
    """Row-tile height such that:
      (a) one output tile stays within `budget_bytes` (so the double-buffered
          pair fits every generation's scoped-VMEM default),
      (b) it is a multiple of 8 unless it covers the whole array,
      (c) there are >= 2 grid tiles whenever rows >= 16, so the writeback DMA
          pipelines and v7x's second TensorCore gets work."""
    if rows <= 8:
        return rows
    tb = max(8, (budget_bytes // (row_width * itemsize)) // 8 * 8)
    if rows >= 16:
        tb = min(tb, max(8, (rows // 2) // 8 * 8))
    return rows if tb >= rows else tb


def time_embedding(t, dim, max_period=10000, *, out_dtype=jnp.float32,
                   tile_budget_bytes=4 << 20, min_pallas_elements=1 << 18,
                   force_pallas=False):
    """Sinusoidal timestep embedding: out[i] = [sin(t_i*emb) | cos(t_i*emb)].

    t: (B,) timesteps.  Returns (B, 2*(dim//2)) array of `out_dtype`.
    """
    B = t.shape[0]
    t = t.astype(jnp.float32)
    half = dim // 2
    # NOTE: divide-by-zero for dim == 2, inherited from the PyTorch module.
    scale = math.log(max_period) / (half - 1)
    emb = jnp.exp(jnp.arange(half, dtype=jnp.float32) * -scale)         # (half,)
    edim = 2 * half                                                      # output width

    # Small-problem fallback: a standalone custom call costs more than the
    # work; let XLA fuse the elementwise expression with its neighbours.
    if (B * edim < min_pallas_elements) and not force_pallas:
        phase = t[:, None] * emb[None, :]
        return jnp.concatenate([jnp.sin(phase), jnp.cos(phase)],
                               axis=-1).astype(out_dtype)

    freq_full = jnp.concatenate([emb, emb])                              # (edim,)
    offset = jnp.concatenate(
        [jnp.zeros((half,), jnp.float32),
         jnp.full((half,), math.pi / 2, jnp.float32)])                   # (edim,)

    # Lane-dense packing: for edim < 128 pack k = 128 // edim timesteps per
    # output row so stores are full-width/unmasked and no VPU lane idles.
    k = 1
    if edim < 128 and 128 % edim == 0 and B % (128 // edim) == 0:
        k = 128 // edim
    rows, W = B // k, k * edim

    t_in = t.reshape(rows, k)                                            # (rows, k)
    eye = jnp.eye(k, dtype=jnp.float32)
    expand = (eye[:, :, None] * freq_full[None, None, :]).reshape(k, W)  # block-diag
    off_row = jnp.tile(offset, (k,)).reshape(1, W)

    out_isz = jnp.dtype(out_dtype).itemsize
    tb = _pick_tile_rows(rows, W, out_isz, tile_budget_bytes)
    grid = (pl.cdiv(rows, tb),)

    # Explicit scoped-VMEM budget: 2x output tile + 2x lane-padded t tile +
    # resident tables, with generous headroom; well under v7x's 64 MiB physical.
    vmem_bytes = (2 * tb * W * out_isz          # double-buffered output tiles
                  + 2 * max(tb, 8) * 128 * 4    # double-buffered t tiles (lane-padded)
                  + 4 * 8 * W * 4)              # freq/offset tables (padded)
    vmem_limit = int(min(48 << 20, max(8 << 20, 2 * vmem_bytes + (2 << 20))))

    cost = pl.CostEstimate(
        flops=(2 * k + 1) * rows * W,
        transcendentals=rows * W,
        bytes_accessed=rows * W * out_isz + rows * k * 4 + (k + 1) * W * 4,
    )

    out_packed = pl.pallas_call(
        _time_embedding_kernel,
        out_shape=jax.ShapeDtypeStruct((rows, W), out_dtype),
        grid=grid,
        in_specs=[
            pl.BlockSpec((tb, k), lambda i: (i, 0)),    # row tile of packed t
            pl.BlockSpec((k, W), lambda i: (0, 0)),     # frequency table: resident
            pl.BlockSpec((1, W), lambda i: (0, 0)),     # offset table: resident
        ],
        out_specs=pl.BlockSpec((tb, W), lambda i: (i, 0)),
        compiler_params=pltpu.CompilerParams(
            dimension_semantics=("parallel",),          # shard row tiles over v7x's 2 TCs
            vmem_limit_bytes=vmem_limit,
        ),
        cost_estimate=cost,
    )(t_in, expand, off_row)

    # Un-pack: (rows, k*edim) -> (B, edim) is row-major contiguous, i.e. a pure
    # metadata reshape with no data movement.
    return out_packed.reshape(B, edim)


def reference(t, dim, max_period=10000):
    """Pure-JAX reference with the original PyTorch formulation (sin | cos)."""
    half = dim // 2
    scale = math.log(max_period) / (half - 1)
    emb = jnp.exp(jnp.arange(half, dtype=jnp.float32) * -scale)
    phase = t[:, None].astype(jnp.float32) * emb[None, :]
    return jnp.concatenate([jnp.sin(phase), jnp.cos(phase)], axis=-1)


if __name__ == "__main__":
    key = jax.random.PRNGKey(0)
    k1, k2 = jax.random.split(key)

    # 1) dim < 128: exercises the lane-dense packed path (k=2, 2-tile grid).
    dim, batch = 64, 64
    t = jax.random.uniform(k1, (batch,), dtype=jnp.float32) * 1000.0
    out = jax.block_until_ready(time_embedding(t, dim, force_pallas=True))
    ref = reference(t, dim)
    assert out.shape == (batch, dim) and out.dtype == jnp.float32
    assert jnp.allclose(out, ref, atol=2e-4, rtol=2e-4), float(
        jnp.max(jnp.abs(out - ref)))

    # 2) dim >= 128: exercises the unpacked (k=1) path, still a 2-tile grid.
    dim2, batch2 = 128, 32
    t2 = jax.random.uniform(k2, (batch2,), dtype=jnp.float32) * 1000.0
    out2 = jax.block_until_ready(time_embedding(t2, dim2, force_pallas=True))
    ref2 = reference(t2, dim2)
    assert out2.shape == (batch2, dim2)
    assert jnp.allclose(out2, ref2, atol=2e-4, rtol=2e-4), float(
        jnp.max(jnp.abs(out2 - ref2)))

    print("KERNEL_OK")
</pallas_src>

<mosaic_0001>
module attributes {stable_mosaic.version = 11 : i64} {
  func.func @_time_embedding_kernel(%arg0: i32, %arg1: memref<16x2xf32, #tpu.memory_space<vmem>>, %arg2: memref<2x128xf32, #tpu.memory_space<vmem>>, %arg3: memref<1x128xf32, #tpu.memory_space<vmem>>, %arg4: memref<16x128xf32, #tpu.memory_space<vmem>>) attributes {dimension_semantics = [#tpu.dimension_semantics<parallel>], iteration_bounds = array<i64: 2>, scalar_prefetch = 0 : i64, scratch_operands = 0 : i64, tpu.core_type = #tpu.core_type<tc>, window_params = [{transform_indices = @transform_0, window_bounds = array<i64: 16, 2>}, {pipeline_mode = #tpu.pipeline_mode<synchronous>, transform_indices = @transform_1, window_bounds = array<i64: 2, 128>}, {pipeline_mode = #tpu.pipeline_mode<synchronous>, transform_indices = @transform_2, window_bounds = array<i64: 1, 128>}, {transform_indices = @transform_3, window_bounds = array<i64: 16, 128>}]} {
    %c0 = arith.constant 0 : index
    %c0_0 = arith.constant 0 : index
    %0 = vector.load %arg1[%c0, %c0_0] : memref<16x2xf32, #tpu.memory_space<vmem>>, vector<16x2xf32>
    %c0_1 = arith.constant 0 : index
    %c0_2 = arith.constant 0 : index
    %1 = vector.load %arg2[%c0_1, %c0_2] : memref<2x128xf32, #tpu.memory_space<vmem>>, vector<2x128xf32>
    %2 = vector.extract_strided_slice %0 {offsets = [0, 0], sizes = [16, 1], strides = [1, 1]} : vector<16x2xf32> to vector<16x1xf32>
    %3 = vector.extract_strided_slice %1 {offsets = [0, 0], sizes = [1, 128], strides = [1, 1]} : vector<2x128xf32> to vector<1x128xf32>
    %4 = vector.broadcast %2 : vector<16x1xf32> to vector<16x128xf32>
    %5 = vector.broadcast %3 : vector<1x128xf32> to vector<16x128xf32>
    %6 = arith.mulf %4, %5 : vector<16x128xf32>
    %7 = vector.extract_strided_slice %0 {offsets = [0, 1], sizes = [16, 1], strides = [1, 1]} : vector<16x2xf32> to vector<16x1xf32>
    %8 = vector.extract_strided_slice %1 {offsets = [1, 0], sizes = [1, 128], strides = [1, 1]} : vector<2x128xf32> to vector<1x128xf32>
    %9 = vector.broadcast %7 : vector<16x1xf32> to vector<16x128xf32>
    %10 = vector.broadcast %8 : vector<1x128xf32> to vector<16x128xf32>
    %11 = arith.mulf %9, %10 : vector<16x128xf32>
    %12 = arith.addf %6, %11 : vector<16x128xf32>
    %c0_3 = arith.constant 0 : index
    %c0_4 = arith.constant 0 : index
    %13 = vector.load %arg3[%c0_3, %c0_4] : memref<1x128xf32, #tpu.memory_space<vmem>>, vector<1x128xf32>
    %14 = vector.broadcast %13 : vector<1x128xf32> to vector<16x128xf32>
    %15 = arith.addf %12, %14 : vector<16x128xf32>
    %16 = math.sin %15 : vector<16x128xf32>
    %c0_5 = arith.constant 0 : index
    %c0_6 = arith.constant 0 : index
    %17 = vector.load %arg4[%c0_5, %c0_6] : memref<16x128xf32, #tpu.memory_space<vmem>>, vector<16x128xf32>
    tpu.vector_store %arg4[%c0_5, %c0_6], %16 {strides = array<i32>} : memref<16x128xf32, #tpu.memory_space<vmem>>, vector<16x128xf32>,
    return
  }
  func.func @transform_0(%arg0: i32) -> (i32, i32) {
    %c0_i32 = arith.constant 0 : i32
    %c0_i32_0 = arith.constant 0 : i32
    return %arg0, %c0_i32 : i32, i32
  }
  func.func @transform_1(%arg0: i32) -> (i32, i32) {
    %c0_i32 = arith.constant 0 : i32
    %c0_i32_0 = arith.constant 0 : i32
    %c0_i32_1 = arith.constant 0 : i32
    return %c0_i32, %c0_i32_0 : i32, i32
  }
  func.func @transform_2(%arg0: i32) -> (i32, i32) {
    %c0_i32 = arith.constant 0 : i32
    %c0_i32_0 = arith.constant 0 : i32
    %c0_i32_1 = arith.constant 0 : i32
    return %c0_i32, %c0_i32_0 : i32, i32
  }
  func.func @transform_3(%arg0: i32) -> (i32, i32) {
    %c0_i32 = arith.constant 0 : i32
    %c0_i32_0 = arith.constant 0 : i32
    return %arg0, %c0_i32 : i32, i32
  }
}

</mosaic_0001>

<bundles_post_ra>
// kernel: tpu_custom_call.1
= control target key start
LH: loop header
LB: loop body
LE: loop exit
PB: predicated region body
PF: predicated region fallthrough
CT: control target
= control target key end

     0   :  { %8 = vsyncpa [#allocation3], 0  ;;  %s867_s0 = inlined_call_operand.vmem [shape: f32[32,2], index: 0, kind: input, shape index: {}]   ;;  %s868_s1 = inlined_call_operand.vmem [shape: f32[2,128], index: 1, kind: input, shape index: {}]   ;;  %s869_s2 = inlined_call_operand.vmem [shape: f32[1,128], index: 2, kind: input, shape index: {}]   ;;  %s870_s3 = inlined_call_operand.hbm [shape: f32[32,128], index: 3, kind: output, shape index: {}]  }
   0x1   :  { %10 = vsyncpa [#allocation3 + $0x1], 0  ;;  %s687_s12 = smov 0   ;;  %s689_s13 = smov 0  }
   0x2   :  { %s691_s14 = smov 0   ;;  %s693_s15 = smov 0  }
   0x3 LB: > { %s708_s16 = sadd.s32 4294967295, %s654_s15   ;;  %s502_s17 = sadd.s32 4294967294, %s654_s15   ;;  %s654_s15 = sphi %s693_s15, %s878_s15   ;;  %s650_s14 = sphi %s691_s14, %s877_s14   ;;  %s646_s13 = sphi %s689_s13, %s876_s13   ;;  %s642_s12 = sphi %s687_s12, %s875_s12  }
   0x4   : > { %s712_s18 = sadd.s32 1, %s654_s15   ;;  %s91_s19 = sadd.s32 1, %s650_s14 }
   0x5   : > { %s88_s20 = ssub.s32 %s654_s15, %s712_s18  ;;  %p101_p0 = scmp.ne.s32.totalorder %s650_s14, %s646_s13 }
   0x6   : > { %p89_p1 = scmp.eq.s32.totalorder %s88_s20, 0  ;;  %p102_p2 = scmp.eq.s32.totalorder %s708_s16, 1 }
   0x7   : > { %p107_p3 = scmp.ne.s32.totalorder %s646_s13, %s642_s12  ;;  %p108_p4 = scmp.eq.s32.totalorder %s502_s17, 1 }
   0x8   : > { %s723_s21 = scalar_select %p89_p1, %s650_s14, %s91_s19  }
   0x9   : > { %p725_p5 = por %p102_p2, %p101_p0  ;;  %p729_p6 = por %p108_p4, %p107_p3 }
   0xa   : > { %p505_p7 = scmp.ge.s32.totalorder %s654_s15, 1  ;;  %p141_p8 = scmp.lt.s32.totalorder %s654_s15, 3 }
   0xc   : > { %p142_p9 = pnand %p505_p7, %p141_p8 }
   0xd   : > { %s507_s24 = sshll.u32 (!%p142_p9), %s708_s16, 1  ;;  %v656_v0 = vmov (!%p142_p9), 1   ;;  %v657_v1 = vmov (!%p142_p9), 0   ;;  %v185_v4 = vlaneseq (!%p142_p9)  ;;  %v174_v8 = vld [vmem:[%s868_s1] sm:$0x3] (!%p142_p9)  ;;  %s162_s6 = sand.u32 (!%p142_p9), 1, %s646_s13  }
   0xe   : > { %145 = sbr.rel (%p142_p9) target bundleno = 264 (0x108), region = 32  ;;  %582 = vset.pattern.permute.xlu1 (!%p142_p9), %v656_v0  ;;  %581 = vset.pattern.permute.xlu0 (!%p142_p9), %v657_v1  ;;  %p166_p10 = scmp.lt.s32.totalorder (!%p142_p9), %s507_s24, 3  ;;  %v509_v15 = vld [vmem:[%s869_s2] ss:$0 sm:$0xff] (!%p142_p9)  ;;  %v658_v40 = vmov (!%p142_p9), 683565275  }
   0xf   : > { %v186_v5 = vshrl.u32 (!%p142_p9), %v185_v4, 7  ;;  %v659_v44 = vmov (!%p142_p9), 2475754826   ;;  %v660_v46 = vmov (!%p142_p9), 2131351028   ;;  %s506_s7 = sshll.u32 (!%p142_p9), %s162_s6, 4 }
  0x10   : > { %v661_v48 = vmov (!%p142_p9), 2102212464   ;;  %v662_v50 = vmov (!%p142_p9), 920167782   ;;  %v663_v57 = vmov (!%p142_p9), 1326507024  }
  0x11   : > { %v201_v6 = vsub.s32 (!%p142_p9), 1, %v186_v5  ;;  %v187_v7 = vsub.s32 (!%p142_p9), 0, %v186_v5  ;;  %s164_s8 = scalar_lea.vmem (!%p142_p9), [#allocation2], %s506_s7  ;;  %s523_s9 = sshll.u32 (!%p142_p9), %s708_s16, 8 }
  0x12   : > { %s440_s10 = sshll.u32 (!%p142_p9), %s164_s8, 4  ;;  %s819_s19 = scalar_lea.hbm (!%p142_p9), %s870_s3, %s523_s9  ;;  %s821_s10 = int_to_ptr.vmem [resolvable:$true] %s440_s10 }
  0x13   : > { %v202_v9 = vrot.slane (!%p142_p9), %v174_v8, %v201_v6  ;;  %v188_v10 = vrot.slane (!%p142_p9), %v174_v8, %v187_v7  ;;  %s826_s16 = scalar_lea.sflag (!%p142_p9), [#allocation3], %s162_s6  ;;  %s592_s20 = scalar_lea.vmem (!%p142_p9), %s821_s10, 256 }
  0x14   : > { %p593_p11 = scmp.ne.s32.totalorder (!%p142_p9), %s821_s10, %s592_s20 }
  0x15   : > { %s880_s24 = smov (!%p166_p10, %s507_s24), 3 }
  0x16   : > { %s508_s25 = sshll.u32 %s880_s24, 3  ;;  %p594_p12 = pnand %p593_p11, %p725_p5 }
  0x17   : > { %s169_s28 = scalar_lea.vmem %s867_s0, %s508_s25  ;;  %s664_s24 = smov [#allocation2]  }
  0x18   : > { %v172_v2 = vld [vmem:[%s169_s28] sm:$0xff]  ;;  %v173_v3 = vld [vmem:[%s169_s28 + $0x8] sm:$0xff]  ;;  %p595_p13 = pneg %p594_p12  ;;  %s596_s25 = sshll.u32 %s664_s24, 4  ;;  %s597_s25 = int_to_ptr.vmem [resolvable:$false] %s596_s25 }
  0x19   : > { %192 = vperm.xlu1 %582, %v172_v2   ;;  %177 = vperm.xlu0 %581, %v172_v2   ;;  %s598_s26 = scalar_lea.vmem %s597_s25, 512  ;;  %p599_p0 = scmp.lt.s32.totalorder %s821_s10, %s597_s25 }
  0x1a   : > { %p600_p1 = scmp.lt.s32.totalorder %s598_s26, %s592_s20 }
  0x1c   : > { %p601_p2 = por %p600_p1, %p599_p0 }
  0x1d   : > { %196 = vperm.xlu1 %582, %v173_v3   ;;  %182 = vperm.xlu0 %581, %v173_v3  }
  0x1e   : > { %p602_p3 = pnand %p601_p2, %p595_p13 }
  0x21   : > { %583 = vset.pattern.permute.xlu0 %v656_v0 }
  0x98   : > { %v193_v11 = vpop.permute.xlu1 %192  ;;  %v178_v12 = vpop.permute.xlu0 %177 }
  0x99   : > { %v203_v13 = vmul.f32 %v202_v9, %v193_v11  ;;  %v189_v14 = vmul.f32 %v188_v10, %v178_v12 }
  0x9b   : > { %v205_v16 = vadd.f32 %v203_v13, %v189_v14 }
  0x9c   : > { %v197_v17 = vpop.permute.xlu1 %196  ;;  %v183_v18 = vpop.permute.xlu0 %182 }
  0x9d   : > { %v745_v19 = vadd.f32 %v509_v15, %v205_v16  ;;  %v204_v20 = vmul.f32 %v202_v9, %v197_v17  ;;  %v190_v21 = vmul.f32 %v188_v10, %v183_v18 }
  0x9f   : > { %v216_v22 = vand.u32 2147483647, %v745_v19  ;;  %v219_v23 = vand.u32 2139095040, %v745_v19  ;;  %v206_v24 = vadd.f32 %v204_v20, %v190_v21  ;;  %vm218_vm14 = vcmp.lt.s32.totalorder %v745_v19, 0 }
  0xa1   : > { %v220_v25 = vshrl.u32 %v219_v23, 23  ;;  %v749_v26 = vadd.f32 %v509_v15, %v206_v24  ;;  %v223_v27 = vand.u32 8388607, %v216_v22  ;;  %vm217_vm15 = vcmp.le.f32.partialorder %v216_v22, 0.7853982 }
  0xa3   : > { %v510_v28 = vadd.s32 4294967169, %v220_v25  ;;  %v323_v29 = vand.u32 2139095040, %v749_v26  ;;  %v224_v31 = vor.u32 8388608, %v223_v27  ;;  %v320_v33 = vand.u32 2147483647, %v749_v26 }
  0xa5   : > { %v226_v30 = vadd.s32 1, %v510_v28  ;;  %v324_v32 = vshrl.u32 %v323_v29, 23  ;;  %v755_v38 = vshll.u32 %v224_v31, 8  ;;  %v327_v42 = vand.u32 8388607, %v320_v33 }
  0xa7   : > { %vm227_vm0 = vcmp.gt.s32.totalorder %v226_v30, 0  ;;  %v514_v35 = vadd.s32 4294967169, %v324_v32  ;;  %v328_v8 = vor.u32 8388608, %v327_v42 }
  0xa8   : > { %v228_v34 = vsel %vm227_vm0, %v226_v30, 0  ;;  %vm322_vm0 = vcmp.lt.s32.totalorder %v749_v26, 0 }
  0xa9   : > { %v229_v36 = vshrl.u32 %v228_v34, 5  ;;  %v230_v37 = vand.u32 31, %v228_v34  ;;  %v330_v43 = vadd.s32 1, %v514_v35  ;;  %v368_v23 = vshll.u32 %v328_v8, 8 }
  0xab   : > { %v231_v39 = vsub.s32 32, %v230_v37  ;;  %v233_v41 = vshll.u32 %v658_v40, %v230_v37  ;;  %v236_v45 = vshll.u32 %v659_v44, %v230_v37  ;;  %v239_v47 = vshll.u32 %v660_v46, %v230_v37 }
  0xac   : > { %v242_v49 = vshll.u32 %v661_v48, %v230_v37  ;;  %v245_v51 = vshll.u32 %v662_v50, %v230_v37  ;;  %vm248_vm1 = vcmp.lt.s32.totalorder %v229_v36, 1  ;;  %vm250_vm2 = vcmp.lt.s32.totalorder %v229_v36, 3 }
  0xad   : > { %v234_v52 = vshrl.u32 %v659_v44, %v231_v39  ;;  %v237_v53 = vshrl.u32 %v660_v46, %v231_v39  ;;  %v240_v54 = vshrl.u32 %v661_v48, %v231_v39  ;;  %v232_v55 = vshrl.u32 %v658_v40, %v231_v39 }
  0xae   : > { %v243_v56 = vshrl.u32 %v662_v50, %v231_v39  ;;  %v246_v58 = vshrl.u32 %v663_v57, %v231_v39  ;;  %vm331_vm3 = vcmp.gt.s32.totalorder %v330_v43, 0  ;;  %vm251_vm4 = vcmp.lt.s32.totalorder %v229_v36, 4 }
  0xaf   : > { %v235_v59 = vor.u32 %v234_v52, %v233_v41  ;;  %v238_v60 = vor.u32 %v237_v53, %v236_v45  ;;  %v241_v61 = vor.u32 %v240_v54, %v239_v47  ;;  %v332_v0 = vsel %vm331_vm3, %v330_v43, 0 }
  0xb0   : > { %v244_v62 = vor.u32 %v243_v56, %v242_v49  ;;  %v247_v63 = vor.u32 %v246_v58, %v245_v51  ;;  %vm249_vm5 = vcmp.lt.s32.totalorder %v229_v36, 2  ;;  %v334_v11 = vand.u32 31, %v332_v0 }
  0xb1   : > { %v252_v1 = vsel %vm248_vm1, %v232_v55, %v235_v59  ;;  %v253_v2 = vsel %vm251_vm4, %v241_v61, 2102212464  ;;  %v256_v3 = vsel %vm248_vm1, %v235_v59, %v238_v60  ;;  %v260_v4 = vsel %vm248_vm1, %v238_v60, %v241_v61 }
  0xb2   : > { %v254_v5 = vsel %vm250_vm2, %v238_v60, %v253_v2  ;;  %v257_v6 = vsel %vm251_vm4, %v244_v62, 920167782  ;;  %v261_v7 = vsel %vm251_vm4, %v247_v63, 1326507024  ;;  %v333_v20 = vshrl.u32 %v332_v0, 5 }
  0xb3   : > { %v258_v9 = vsel %vm250_vm2, %v241_v61, %v257_v6  ;;  %v262_v10 = vsel %vm250_vm2, %v244_v62, %v261_v7  ;;  %v255_v12 = vsel %vm249_vm5, %v252_v1, %v254_v5  ;;  %v335_v21 = vsub.s32 32, %v334_v11 }
  0xb4   : > { %v259_v13 = vsel %vm249_vm5, %v256_v3, %v258_v9  ;;  %v263_v14 = vsel %vm249_vm5, %v260_v4, %v262_v10  ;;  %v271_v24 = vmul.u32 %v755_v38, %v255_v12  ;;  %v337_v25 = vshll.u32 %v658_v40, %v334_v11 }
  0xb5   : > { %v768_v15 = vmul.u32.u64.low %v755_v38, %v263_v14  ;;  %v769_v16 = vmul.u32.u64.high %v755_v38, %v263_v14, %v768_v15  ;;  %v772_v17 = vmul.u32.u64.low %v755_v38, %v259_v13  ;;  %v773_v18 = vmul.u32.u64.high %v755_v38, %v259_v13, %v772_v17 }
  0xb6   : > { %v340_v27 = vshll.u32 %v659_v44, %v334_v11  ;;  %v343_v28 = vshll.u32 %v660_v46, %v334_v11  ;;  %v338_v29 = vshrl.u32 %v659_v44, %v335_v21  ;;  %v341_v30 = vshrl.u32 %v660_v46, %v335_v21 }
  0xb7   : > { %v344_v31 = vshrl.u32 %v661_v48, %v335_v21  ;;  %v346_v32 = vshll.u32 %v661_v48, %v334_v11  ;;  %vm273_vm6 = vc.u32 %v769_v16, %v772_v17  ;;  %v274_v34 = vadd.s32 1, %v773_v18 }
  0xb8   : > { %v347_v35 = vshrl.u32 %v662_v50, %v335_v21  ;;  %v349_v36 = vshll.u32 %v662_v50, %v334_v11  ;;  %v339_v37 = vor.u32 %v338_v29, %v337_v25  ;;  %v342_v39 = vor.u32 %v341_v30, %v340_v27 }
  0xb9   : > { %v345_v41 = vor.u32 %v344_v31, %v343_v28  ;;  %v350_v42 = vshrl.u32 %v663_v57, %v335_v21  ;;  %v275_v38 = vsel %vm273_vm6, %v274_v34, %v773_v18  ;;  %vm352_vm7 = vcmp.lt.s32.totalorder %v333_v20, 1 }
  0xba   : > { %v348_v43 = vor.u32 %v347_v35, %v346_v32  ;;  %vm355_vm8 = vcmp.lt.s32.totalorder %v333_v20, 4  ;;  %v276_v44 = vadd.s32 %v275_v38, %v271_v24  ;;  %vm354_vm9 = vcmp.lt.s32.totalorder %v333_v20, 3 }
  0xbb   : > { %v351_v45 = vor.u32 %v350_v42, %v349_v36  ;;  %v357_v46 = vsel %vm355_vm8, %v345_v41, 2102212464  ;;  %v336_v47 = vshrl.u32 %v658_v40, %v335_v21  ;;  %v360_v48 = vsel %vm352_vm7, %v339_v37, %v342_v39 }
  0xbc   : > { %v361_v49 = vsel %vm355_vm8, %v348_v43, 920167782  ;;  %v364_v51 = vsel %vm352_vm7, %v342_v39, %v345_v41  ;;  %v277_v52 = vadd.s32 536870912, %v276_v44  ;;  %vm353_vm10 = vcmp.lt.s32.totalorder %v333_v20, 2 }
  0xbd   : > { %v362_v50 = vsel %vm354_vm9, %v345_v41, %v361_v49  ;;  %v365_v53 = vsel %vm355_vm8, %v351_v45, 1326507024  ;;  %v356_v54 = vsel %vm352_vm7, %v336_v47, %v339_v37  ;;  %v358_v55 = vsel %vm354_vm9, %v342_v39, %v357_v46 }
  0xbe   : > { %v363_v56 = vsel %vm353_vm10, %v360_v48, %v362_v50  ;;  %v366_v57 = vsel %vm354_vm9, %v348_v43, %v365_v53  ;;  %v278_v58 = vshrl.u32 %v277_v52, 30  ;;  %v359_v0 = vsel %vm353_vm10, %v356_v54, %v358_v55 }
  0xbf   : > { %v367_v59 = vsel %vm353_vm10, %v364_v51, %v366_v57  ;;  %v783_v60 = vmul.u32.u64.low %v368_v23, %v363_v56  ;;  %v784_v61 = vmul.u32.u64.high %v368_v23, %v363_v56, %v783_v60  ;;  %v375_v3 = vmul.u32 %v368_v23, %v359_v0 }
  0xc0   : > { %v786_v62 = vmul.u32.u64.low %v368_v23, %v367_v59  ;;  %v787_v63 = vmul.u32.u64.high %v368_v23, %v367_v59, %v786_v62  ;;  %v279_v40 = vshll.u32 %v278_v58, 30  ;;  %v272_v15 = vadd.s32 %v772_v17, %v769_v16 }
  0xc1   : > { %v378_v2 = vadd.s32 1, %v784_v61  ;;  %v302_v37 = vsub.s32 4, %v278_v58  ;;  %vm803_vm1 = vcmp.le.f32.partialorder %v320_v33, 0.7853982  ;;  %vm308_vm5 = vweird.f32 %v745_v19 }
  0xc2   : > { %v280_v1 = vsub.s32 %v276_v44, %v279_v40  ;;  %vm377_vm11 = vc.u32 %v787_v63, %v783_v60  ;;  %v376_v16 = vadd.s32 %v783_v60, %v787_v63  ;;  %vm412_vm9 = vweird.f32 %v749_v26 }
  0xc3   : > { %v379_v5 = vsel %vm377_vm11, %v378_v2, %v784_v61  ;;  %v303_v46 = vsel %vm218_vm14, %v302_v37, %v278_v58 }
  0xc4   : > { %v282_v4 = vsub.s32 0, %v280_v1  ;;  %v380_v6 = vadd.s32 %v379_v5, %v375_v3  ;;  %v305_v51 = vsel %vm217_vm15, 0, %v303_v46 }
  0xc5   : > { %v309_v54 = vadd.s32 3, %v305_v51 }
  0xc6   : > { %v511_v7 = vmin.u32 %v282_v4, %v280_v1  ;;  %v381_v8 = vadd.s32 536870912, %v380_v6 }
  0xc7   : > { %v310_v22 = vand.u32 3, %v309_v54 }
  0xc8   : > { %v284_v9 = vclz %v511_v7  ;;  %v382_v10 = vshrl.u32 %v381_v8, 30 }
  0xc9   : > { %vm315_vm2 = vcmp.eq.s32.totalorder %v310_v22, 2  ;;  %vm312_vm3 = vcmp.eq.s32.totalorder %v310_v22, 0  ;;  %vm311_vm4 = vcmp.lt.s32.totalorder %v310_v22, 2 }
  0xca   : > { %v512_v11 = vadd.s32 4294967294, %v284_v9  ;;  %v383_v12 = vshll.u32 %v382_v10, 30  ;;  %v406_v56 = vsub.s32 4, %v382_v10 }
  0xcc   : > { %vm513_vm12 = vcmp.lt.s32.totalorder %v512_v11, 0  ;;  %v384_v14 = vsub.s32 %v380_v6, %v383_v12  ;;  %v407_v60 = vsel %vm322_vm0, %v406_v56, %v382_v10 }
  0xcd   : > { %v287_v13 = vsel %vm513_vm12, 0, %v512_v11  ;;  %v409_v0 = vsel %vm803_vm1, 0, %v407_v60 }
  0xce   : > { %v288_v18 = vsub.s32 32, %v287_v13  ;;  %v292_v20 = vsub.s32 4294967266, %v287_v13  ;;  %v386_v21 = vsub.s32 0, %v384_v14  ;;  %v289_v23 = vshll.u32 %v280_v1, %v287_v13 }
  0xcf   : > { %v413_v3 = vadd.s32 3, %v409_v0 }
  0xd0   : > { %v290_v24 = vshrl.u32 %v272_v15, %v288_v18  ;;  %v293_v25 = vadd.s32 127, %v292_v20  ;;  %v515_v27 = vmin.u32 %v386_v21, %v384_v14 }
  0xd1   : > { %v414_v6 = vand.u32 3, %v413_v3 }
  0xd2   : > { %v291_v28 = vor.u32 %v290_v24, %v289_v23  ;;  %v294_v29 = vshll.u32 %v293_v25, 23  ;;  %v388_v30 = vclz %v515_v27 }
  0xd3   : > { %vm419_vm6 = vcmp.eq.s32.totalorder %v414_v6, 2  ;;  %vm416_vm7 = vcmp.eq.s32.totalorder %v414_v6, 0  ;;  %vm415_vm8 = vcmp.lt.s32.totalorder %v414_v6, 2 }
  0xd4   : > { %v295_v31 = vor.u32 4788187, %v294_v29  ;;  %v516_v32 = vadd.s32 4294967294, %v388_v30  ;;  %v298_v35 = vcvt.s32.f32 %v291_v28 }
  0xd6   : > { %v296_v34 = vand.u32 2147483647, %v295_v31  ;;  %vm517_vm13 = vcmp.lt.s32.totalorder %v516_v32, 0 }
  0xd7   : > { %v391_v39 = vsel %vm517_vm13, 0, %v516_v32 }
  0xd8   : > { %v299_v36 = vmul.f32 %v298_v35, %v296_v34  ;;  %v392_v17 = vsub.s32 32, %v391_v39  ;;  %v396_v41 = vsub.s32 4294967266, %v391_v39  ;;  %v393_v38 = vshll.u32 %v384_v14, %v391_v39 }
  0xda   : > { %v300_v42 = vxor.u32 2147483648, %v299_v36  ;;  %v394_v43 = vshrl.u32 %v376_v16, %v392_v17  ;;  %v397_v44 = vadd.s32 127, %v396_v41 }
  0xdc   : > { %v301_v45 = vsel %vm218_vm14, %v300_v42, %v299_v36  ;;  %v395_v48 = vor.u32 %v394_v43, %v393_v38  ;;  %v398_v49 = vshll.u32 %v397_v44, 23 }
  0xdd   : > { %v304_v47 = vsel %vm217_vm15, %v745_v19, %v301_v45 }
  0xde   : > { %584 = vcosq.f32 %v304_v47  ;;  %v399_v52 = vor.u32 4788187, %v398_v49  ;;  %v402_v53 = vcvt.s32.f32 %v395_v48 }
  0xdf   : > { %586 = vsinq.f32 %v304_v47 }
  0xe0   : > { %v400_v50 = vand.u32 2147483647, %v399_v52 }
  0xe2   : > { %v403_v55 = vmul.f32 %v402_v53, %v400_v50 }
  0xe4   : > { %v404_v57 = vxor.u32 2147483648, %v403_v55 }
  0xe6   : > { %v405_v59 = vsel %vm322_vm0, %v404_v57, %v403_v55 }
  0xe7   : > { %v408_v62 = vsel %vm803_vm1, %v749_v26, %v405_v59 }
  0xe8   : > { %v585_v61 = vpop.eup %584  ;;  %588 = vcosq.f32 %v408_v62 }
  0xe9   : > { %v587_v63 = vpop.eup %586  ;;  %v316_v40 = vxor.u32 2147483648, %v585_v61  ;;  %590 = vsinq.f32 %v408_v62 }
  0xea   : > { %v313_v33 = vxor.u32 2147483648, %v587_v63 }
  0xeb   : > { %v317_v1 = vsel %vm315_vm2, %v316_v40, %v587_v63 }
  0xec   : > { %v314_v2 = vsel %vm312_vm3, %v585_v61, %v313_v33 }
  0xed   : > { %v318_v4 = vsel %vm311_vm4, %v314_v2, %v317_v1 }
  0xee   : > { %v319_v5 = vsel %vm308_vm5, nan, %v318_v4 }
  0xef   : > { %424 = vst [vmem:[%s164_s8] sm:$0xff] %v319_v5 }
  0xf2   : > { %v589_v7 = vpop.eup %588 }
  0xf3   : > { %v591_v8 = vpop.eup %590  ;;  %v420_v9 = vxor.u32 2147483648, %v589_v7 }
  0xf4   : > { %v417_v10 = vxor.u32 2147483648, %v591_v8 }
  0xf5   : > { %v421_v11 = vsel %vm419_vm6, %v420_v9, %v591_v8 }
  0xf6   : > { %v418_v12 = vsel %vm416_vm7, %v589_v7, %v417_v10 }
  0xf7   : > { %v422_v19 = vsel %vm415_vm8, %v418_v12, %v421_v11 }
  0xf8   : > { %v423_v13 = vsel %vm412_vm9, nan, %v422_v19 }
  0xf9   : > { %425 = vst [vmem:[%s164_s8 + $0x8] sm:$0xff] %v423_v13 }
  0xfa   : > { %605 = shalt.err (!%p602_p3)
}
  0xfb   : > { %s606_s27 = scalar_lea.hbm %s819_s19, 256  ;;  %s610_s30 = scalar_lea.hbm %s870_s3, 512 }
  0xfc   : > { %p607_p4 = scmp.ne.s32.totalorder %s819_s19, %s606_s27  ;;  %p611_p9 = scmp.lt.u32.totalorder %s819_s19, %s870_s3 }
  0xfd   : > { %p612_p10 = scmp.lt.u32.totalorder %s610_s30, %s606_s27  ;;  %p614_p12 = scmp.lt.u32.totalorder %s606_s27, %s819_s19 }
  0xfe   : > { %p608_p7 = pnand %p607_p4, %p725_p5 }
  0xff   : > { %p613_p11 = por %p612_p10, %p611_p9 }
 0x100   : > { %p609_p8 = pneg %p608_p7 }
 0x101   : > { %p615_p13 = por %p614_p12, %p613_p11 }
 0x103   : > { %p616_p0 = pnand %p615_p13, %p609_p8 }
 0x105   : > { %619 = shalt.err (!%p616_p0)
}
 0x106   : > { %s665_s6 = smov 128   ;;  %s666_s7 = smov 8  }
 0x107   : > { %532 = dma.vmem_to_hbm [thread:$0]  (%p725_p5), %s821_s10, 256, %s819_s19, %s826_s16, %s665_s6, %s665_s6, %s666_s7  }
 0x108 PF: > { %p538_p1 = scmp.ge.s32.totalorder %s654_s15, 2  ;;  %s455_s8 = sand.u32 1, %s642_s12  }
 0x109   : > { %s456_s9 = scalar_lea.sflag [#allocation3], %s455_s8 }
 0x10a   : > { %p535_p2 = pnand %p538_p1, %p729_p6 }
 0x10c   : > { %637 = dma.done.wait (!%p535_p2), %s456_s9, 256  }
 0x10d   : > { %639 = vsyncadd (!%p535_p2), %s456_s9, 4294967040  ;;  %p13_p3 = scmp.ge.s32.totalorder %s712_s18, 4   ;;  %s875_s12 = smov %s646_s13 }
 0x10e   : > { %s876_s13 = smov %s650_s14  ;;  %s877_s14 = smov %s723_s21 }
 0x10f   : > { %s878_s15 = smov %s712_s18  ;;  %15 = sbr.rel (!%p13_p3) target bundleno = 3 (0x3), region = 67 }
 0x116   :  { %461 = vsyncpa [#allocation3], 1 }
 0x117   :  { %463 = vsyncpa [#allocation3 + $0x1], 1 }

</bundles_post_ra>
